<compile_context>
chip_gen: v5e
topology: v5e:2x2
jax: 0.10.0
libtpu: 0.0.40
codegen_flags: <defaults>
</compile_context>

<pallas_src>
import jax
import jax.numpy as jnp
from jax import lax
from jax.experimental import pallas as pl
from jax.experimental.pallas import tpu as pltpu

IN_FEATURES = 100
OUT_FEATURES = 10
DEFAULT_TILE_B = 4096  # rows of x per grid step; sweep 2048-8192


def _round_up(n, m):
    return ((n + m - 1) // m) * m


def linear_kernel(x_ref, w_ref, b_ref, o_ref):
    # x_ref: (TB, 100)  w_ref: (100, 10)  b_ref: (1, 10)  o_ref: (TB, 10)
    acc = jnp.dot(
        x_ref[...],
        w_ref[...],
        preferred_element_type=jnp.float32,
        precision=lax.Precision.HIGHEST,
    )
    o_ref[...] = (acc + b_ref[...]).astype(o_ref.dtype)


def _choose_tile(batch, tile_b):
    # Tile must be a multiple of 8 (sublane constraint); cap at tile_b.
    tb = min(tile_b, _round_up(batch, 8))
    # v7x megacore: if one tile would cover a mid/large batch, split into 2 tiles so
    # both TensorCores stream. On 1-TC chips this costs one extra ~0.35 us step.
    if batch >= 2048 and pl.cdiv(batch, tb) < 2:
        tb = _round_up(pl.cdiv(batch, 2), 8)
    return tb


def simple_model_forward(x, weight, bias, tile_b=DEFAULT_TILE_B):
    """x: any shape with total elements divisible by 100 (like torch .view(-1, 100)).
    weight: (10, 100) as in PyTorch nn.Linear; bias: (10,)."""
    x2d = x.reshape(-1, IN_FEATURES)             # glue: the .view(-1, 100)
    batch = x2d.shape[0]

    tb = _choose_tile(batch, tile_b)
    grid = (pl.cdiv(batch, tb),)                 # partial last block handled by Pallas

    w_t = weight.T                               # (100, 10), resident in VMEM
    b2d = bias.reshape(1, OUT_FEATURES)          # keep 2-D for TPU layout

    # Double-buffered x + out blocks, both lane-padded to 128 -> ~tb*2 KiB total,
    # plus a small margin for the resident weight/bias and compiler scratch.
    vmem_needed = 2 * (tb * 128 * 4) * 2 + (2 << 20)
    vmem_limit = int(min(48 << 20, max(16 << 20, vmem_needed)))

    cost = pl.CostEstimate(
        flops=2 * batch * IN_FEATURES * OUT_FEATURES,
        transcendentals=0,
        bytes_accessed=(
            batch * IN_FEATURES * 4             # x reads
            + batch * OUT_FEATURES * 4          # output writes
            + IN_FEATURES * OUT_FEATURES * 4    # weight (fetched once)
            + OUT_FEATURES * 4                  # bias
        ),
    )

    return pl.pallas_call(
        linear_kernel,
        out_shape=jax.ShapeDtypeStruct((batch, OUT_FEATURES), x2d.dtype),
        grid_spec=pltpu.PrefetchScalarGridSpec(
            num_scalar_prefetch=0,
            grid=grid,
            in_specs=[
                pl.BlockSpec((tb, IN_FEATURES), lambda i: (i, 0)),
                pl.BlockSpec((IN_FEATURES, OUT_FEATURES), lambda i: (0, 0)),
                pl.BlockSpec((1, OUT_FEATURES), lambda i: (0, 0)),
            ],
            out_specs=pl.BlockSpec((tb, OUT_FEATURES), lambda i: (i, 0)),
        ),
        compiler_params=pltpu.CompilerParams(
            dimension_semantics=("parallel",),   # v7x megacore: shard tiles over TCs
            vmem_limit_bytes=vmem_limit,
        ),
        cost_estimate=cost,
    )(x2d, w_t, b2d)


if __name__ == "__main__":
    key = jax.random.PRNGKey(0)
    k_x, k_w, k_b, k_x2 = jax.random.split(key, 4)

    # Deterministic parameter init (PyTorch-style uniform(-1/sqrt(fan_in), 1/sqrt(fan_in)))
    bound = 1.0 / (IN_FEATURES ** 0.5)
    weight = jax.random.uniform(
        k_w, (OUT_FEATURES, IN_FEATURES), dtype=jnp.float32, minval=-bound, maxval=bound
    )
    bias = jax.random.uniform(
        k_b, (OUT_FEATURES,), dtype=jnp.float32, minval=-bound, maxval=bound
    )

    # Small input: (2, 4, 100) -> view(-1, 100) gives batch 8 (single small tile)
    x = jax.random.normal(k_x, (2, 4, IN_FEATURES), dtype=jnp.float32)
    out = jax.block_until_ready(simple_model_forward(x, weight, bias))
    ref = x.reshape(-1, IN_FEATURES) @ weight.T + bias
    assert out.shape == (8, OUT_FEATURES)
    assert jnp.allclose(out, ref, atol=1e-4, rtol=1e-4)

    # Exercise the multi-tile + partial-last-block (no-pad) path:
    # batch 2500 with tile_b=1024 -> grid=(3,), last block only 452 valid rows.
    x_big = jax.random.normal(k_x2, (2500, IN_FEATURES), dtype=jnp.float32)
    out_big = jax.block_until_ready(simple_model_forward(x_big, weight, bias, tile_b=1024))
    ref_big = x_big @ weight.T + bias
    assert out_big.shape == (2500, OUT_FEATURES)
    assert jnp.allclose(out_big, ref_big, atol=1e-4, rtol=1e-4)

    print("KERNEL_OK")
</pallas_src>

<mosaic_0001>
module attributes {stable_mosaic.version = 11 : i64} {
  func.func @linear_kernel(%arg0: i32, %arg1: memref<8x100xf32, #tpu.memory_space<vmem>>, %arg2: memref<100x10xf32, #tpu.memory_space<vmem>>, %arg3: memref<1x10xf32, #tpu.memory_space<vmem>>, %arg4: memref<8x10xf32, #tpu.memory_space<vmem>>) attributes {dimension_semantics = [#tpu.dimension_semantics<parallel>], iteration_bounds = array<i64: 1>, scalar_prefetch = 0 : i64, scratch_operands = 0 : i64, tpu.core_type = #tpu.core_type<tc>, window_params = [{transform_indices = @transform_0, window_bounds = array<i64: 8, 100>}, {pipeline_mode = #tpu.pipeline_mode<synchronous>, transform_indices = @transform_1, window_bounds = array<i64: 100, 10>}, {pipeline_mode = #tpu.pipeline_mode<synchronous>, transform_indices = @transform_2, window_bounds = array<i64: 1, 10>}, {transform_indices = @transform_3, window_bounds = array<i64: 8, 10>}]} {
    %c0 = arith.constant 0 : index
    %c0_0 = arith.constant 0 : index
    %0 = vector.load %arg1[%c0, %c0_0] : memref<8x100xf32, #tpu.memory_space<vmem>>, vector<8x100xf32>
    %c0_1 = arith.constant 0 : index
    %c0_2 = arith.constant 0 : index
    %1 = vector.load %arg2[%c0_1, %c0_2] : memref<100x10xf32, #tpu.memory_space<vmem>>, vector<100x10xf32>
    %cst = arith.constant dense<0.000000e+00> : vector<8x10xf32>
    %2 = tpu.matmul %0, %1, %cst {dimension_numbers = #tpu.dot_dimension_numbers<[1], [0], [0], [1], [0, 0, 1, 1], [], []>, precision = #tpu.contract_precision<fp32>} : vector<8x100xf32>, vector<100x10xf32>, vector<8x10xf32> -> vector<8x10xf32>
    %c0_3 = arith.constant 0 : index
    %c0_4 = arith.constant 0 : index
    %3 = vector.load %arg3[%c0_3, %c0_4] : memref<1x10xf32, #tpu.memory_space<vmem>>, vector<1x10xf32>
    %4 = vector.broadcast %3 : vector<1x10xf32> to vector<8x10xf32>
    %5 = arith.addf %2, %4 : vector<8x10xf32>
    %c0_5 = arith.constant 0 : index
    %c0_6 = arith.constant 0 : index
    %6 = vector.load %arg4[%c0_5, %c0_6] : memref<8x10xf32, #tpu.memory_space<vmem>>, vector<8x10xf32>
    tpu.vector_store %arg4[%c0_5, %c0_6], %5 {strides = array<i32>} : memref<8x10xf32, #tpu.memory_space<vmem>>, vector<8x10xf32>,
    return
  }
  func.func @transform_0(%arg0: i32) -> (i32, i32) {
    %c0_i32 = arith.constant 0 : i32
    %c0_i32_0 = arith.constant 0 : i32
    return %arg0, %c0_i32 : i32, i32
  }
  func.func @transform_1(%arg0: i32) -> (i32, i32) {
    %c0_i32 = arith.constant 0 : i32
    %c0_i32_0 = arith.constant 0 : i32
    %c0_i32_1 = arith.constant 0 : i32
    return %c0_i32, %c0_i32_0 : i32, i32
  }
  func.func @transform_2(%arg0: i32) -> (i32, i32) {
    %c0_i32 = arith.constant 0 : i32
    %c0_i32_0 = arith.constant 0 : i32
    %c0_i32_1 = arith.constant 0 : i32
    return %c0_i32, %c0_i32_0 : i32, i32
  }
  func.func @transform_3(%arg0: i32) -> (i32, i32) {
    %c0_i32 = arith.constant 0 : i32
    %c0_i32_0 = arith.constant 0 : i32
    return %arg0, %c0_i32 : i32, i32
  }
}

</mosaic_0001>

<bundles_post_ra>
// kernel: tpu_custom_call.1
= control target key start
LH: loop header
LB: loop body
LE: loop exit
PB: predicated region body
PF: predicated region fallthrough
CT: control target
= control target key end

     0   :  { %vm37_vm0 = vcmask 1043456   ;;  %s647_s0 = inlined_call_operand.vmem [shape: f32[8,100], index: 0, kind: input, shape index: {}]   ;;  %s648_s1 = inlined_call_operand.vmem [shape: f32[100,10], index: 1, kind: input, shape index: {}]   ;;  %s649_s2 = inlined_call_operand.vmem [shape: f32[1,10], index: 2, kind: input, shape index: {}]   ;;  %s650_s3 = inlined_call_operand.hbm [shape: f32[8,10], index: 3, kind: output, shape index: {}]  }
   0x1   :  { %v28_v0 = vld [vmem:[%s648_s1 + $0x60] sm:$0xf]  ;;  %v27_v1 = vld [vmem:[%s648_s1 + $0x58] sm:$0xff]  ;;  %v26_v2 = vld [vmem:[%s648_s1 + $0x50] sm:$0xff] }
   0x2   :  { %v39_v3 = vsel %vm37_vm0, %v28_v0, 0  ;;  %v419_v4 = vand.u32 4294901760, %v27_v1  ;;  %v421_v5 = vand.u32 4294901760, %v26_v2  ;;  %v25_v6 = vld [vmem:[%s648_s1 + $0x48] sm:$0xff]  ;;  %v24_v7 = vld [vmem:[%s648_s1 + $0x40] sm:$0xff]  ;;  %v23_v8 = vld [vmem:[%s648_s1 + $0x38] sm:$0xff] }
   0x3   :  { %v432_v9 = vand.u32 4294901760, %v39_v3  ;;  %v434_v10 = vand.u32 4294901760, %v25_v6  ;;  %v436_v11 = vand.u32 4294901760, %v24_v7  ;;  %v438_v12 = vand.u32 4294901760, %v23_v8  ;;  %v22_v13 = vld [vmem:[%s648_s1 + $0x30] sm:$0xff]  ;;  %v21_v14 = vld [vmem:[%s648_s1 + $0x28] sm:$0xff] }
   0x4   :  { %v447_v15 = vsub.f32 %v27_v1, %v419_v4  ;;  %v450_v16 = vsub.f32 %v26_v2, %v421_v5  ;;  %v452_v17 = vand.u32 4294901760, %v22_v13  ;;  %v469_v24 = vand.u32 4294901760, %v21_v14  ;;  %v20_v25 = vld [vmem:[%s648_s1 + $0x20] sm:$0xff] }
   0x5   :  { %45 = vmatpush.msra.mxu0 %v432_v9  ;;  %v456_v18 = vsub.f32 %v39_v3, %v432_v9  ;;  %v459_v19 = vsub.f32 %v25_v6, %v434_v10  ;;  %v462_v20 = vsub.f32 %v24_v7, %v436_v11  ;;  %v467_v23 = vsub.f32 %v23_v8, %v438_v12 }
   0x6   :  { %v90_v21 = vand.u32 4294901760, %v447_v15  ;;  %v96_v22 = vand.u32 4294901760, %v450_v16  ;;  %217 = vmatpush.msra.mxu3 %v432_v9 }
   0x7   :  { %8 = vsyncpa [#allocation3], 0  ;;  %47 = vmatpush.msra.mxu0 %v419_v4  ;;  %v84_v26 = vand.u32 4294901760, %v456_v18  ;;  %v102_v27 = vand.u32 4294901760, %v459_v19  ;;  %170 = vmatpush.msra.mxu2 %v456_v18  ;;  %v108_v29 = vand.u32 4294901760, %v462_v20  ;;  %v484_v30 = vsub.f32 %v22_v13, %v452_v17  ;;  %v19_v34 = vld [vmem:[%s648_s1 + $0x18] sm:$0xff] }
   0x8   :  { %v91_v28 = vsub.f32 %v447_v15, %v90_v21  ;;  %219 = vmatpush.msra.mxu3 %v419_v4  ;;  %v97_v32 = vsub.f32 %v450_v16, %v96_v22  ;;  %v494_v33 = vand.u32 4294901760, %v20_v25  ;;  %v114_v35 = vand.u32 4294901760, %v467_v23  ;;  %v18_v37 = vld [vmem:[%s648_s1 + $0x10] sm:$0xff]  ;;  %v15_v41 = vld [vmem:[%s647_s0] sm:$0xff]  ;;  %v17_v45 = vld [vmem:[%s648_s1 + $0x8] sm:$0xff]  ;;  %s389_s13 = smov [#allocation2]  }
   0x9   :  { %v85_v31 = vsub.f32 %v456_v18, %v84_v26  ;;  %49 = vmatpush.msra.mxu0 %v421_v5  ;;  %v501_v36 = vsub.f32 %v21_v14, %v469_v24  ;;  %173 = vmatpush.msra.mxu2 %v447_v15  ;;  %v103_v40 = vsub.f32 %v459_v19, %v102_v27  ;;  %v120_v43 = vand.u32 4294901760, %v484_v30  ;;  %v16_v51 = vld [vmem:[%s648_s1] sm:$0xff]  ;;  %s350_s14 = sshll.u32 %s389_s13, 4  ;;  %s352_s17 = sshll.u32 %s650_s3, 4  ;;  %s351_s14 = int_to_ptr.vmem [resolvable:$true] %s350_s14  ;;  %s353_s17 = int_to_ptr.hbm [resolvable:$true] %s352_s17 }
   0xa   :  { %221 = vmatpush.msra.mxu3 %v421_v5  ;;  %v92_v39 = vand.u32 4294901760, %v91_v28  ;;  %v109_v42 = vsub.f32 %v462_v20, %v108_v29  ;;  %v519_v44 = vand.u32 4294901760, %v19_v34  ;;  %v98_v46 = vand.u32 4294901760, %v97_v32 }
   0xb   :  { %v86_v38 = vand.u32 4294901760, %v85_v31  ;;  %51 = vmatpush.msra.mxu0 %v434_v10  ;;  %176 = vmatpush.msra.mxu2 %v450_v16  ;;  %v528_v47 = vsub.f32 %v20_v25, %v494_v33  ;;  %v530_v48 = vand.u32 4294901760, %v18_v37  ;;  %vm33_vm1 = vcmask 818176  }
   0xc   :  { %223 = vmatpush.msra.mxu3 %v434_v10  ;;  %v115_v49 = vsub.f32 %v467_v23, %v114_v35  ;;  %v126_v50 = vand.u32 4294901760, %v501_v36  ;;  %v35_v52 = vsel %vm33_vm1, %v15_v41, 0  ;;  %v104_v53 = vand.u32 4294901760, %v103_v40 }
   0xd   :  { %87 = vmatpush.msra.mxu1 %v86_v38  ;;  %53 = vmatpush.msra.mxu0 %v436_v11  ;;  %v543_v54 = vsub.f32 %v19_v34, %v519_v44  ;;  %v545_v55 = vand.u32 4294901760, %v17_v45  ;;  %v547_v56 = vand.u32 4294901760, %v35_v52  ;;  %v121_v57 = vsub.f32 %v484_v30, %v120_v43 }
   0xe   :  { %179 = vmatpush.msra.mxu2 %v459_v19  ;;  %225 = vmatpush.msra.mxu3 %v436_v11  ;;  %v110_v58 = vand.u32 4294901760, %v109_v42  ;;  %v132_v59 = vand.u32 4294901760, %v528_v47  ;;  %v557_v60 = vsub.f32 %v18_v37, %v530_v48  ;;  %v559_v61 = vand.u32 4294901760, %v16_v51 }
   0xf   :  { %93 = vmatpush.msra.mxu1 %v92_v39  ;;  %55 = vmatpush.msra.mxu0 %v438_v12  ;;  %v116_v62 = vand.u32 4294901760, %v115_v49  ;;  %v127_v63 = vsub.f32 %v501_v36, %v126_v50  ;;  %v138_v0 = vand.u32 4294901760, %v543_v54  ;;  %v569_v1 = vsub.f32 %v17_v45, %v545_v55 }
  0x10   :  { %182 = vmatpush.msra.mxu2 %v462_v20  ;;  %227 = vmatpush.msra.mxu3 %v438_v12  ;;  %v71_v2 = vsub.f32 %v35_v52, %v547_v56  ;;  %v122_v3 = vand.u32 4294901760, %v121_v57  ;;  %v133_v6 = vsub.f32 %v528_v47, %v132_v59  ;;  %v144_v7 = vand.u32 4294901760, %v557_v60 }
  0x11   :  { %99 = vmatpush.msra.mxu1 %v98_v46  ;;  %57 = vmatpush.msra.mxu0 %v452_v17  ;;  %v580_v8 = vsub.f32 %v16_v51, %v559_v61  ;;  %v128_v13 = vand.u32 4294901760, %v127_v63  ;;  %v139_v14 = vsub.f32 %v543_v54, %v138_v0  ;;  %v150_v25 = vand.u32 4294901760, %v569_v1 }
  0x12   :  { %185 = vmatpush.msra.mxu2 %v467_v23  ;;  %229 = vmatpush.msra.mxu3 %v452_v17  ;;  %v72_v28 = vand.u32 4294901760, %v71_v2  ;;  %v134_v31 = vand.u32 4294901760, %v133_v6  ;;  %v145_v32 = vsub.f32 %v557_v60, %v144_v7  ;;  %vm343_vm2 = vcmask 80896  }
  0x13   :  { %105 = vmatpush.msra.mxu1 %v104_v53  ;;  %59 = vmatpush.msra.mxu0 %v469_v24  ;;  %v156_v34 = vand.u32 4294901760, %v580_v8  ;;  %v140_v37 = vand.u32 4294901760, %v139_v14  ;;  %v151_v38 = vsub.f32 %v569_v1, %v150_v25 }
  0x14   :  { %188 = vmatpush.msra.mxu2 %v484_v30  ;;  %231 = vmatpush.msra.mxu3 %v469_v24  ;;  %v73_v39 = vsub.f32 %v71_v2, %v72_v28  ;;  %v146_v40 = vand.u32 4294901760, %v145_v32 }
  0x15   :  { %111 = vmatpush.msra.mxu1 %v110_v58  ;;  %61 = vmatpush.msra.mxu0 %v494_v33  ;;  %v157_v41 = vsub.f32 %v580_v8, %v156_v34  ;;  %v152_v42 = vand.u32 4294901760, %v151_v38 }
  0x16   :  { %191 = vmatpush.msra.mxu2 %v501_v36  ;;  %233 = vmatpush.msra.mxu3 %v494_v33  ;;  %v74_v45 = vand.u32 4294901760, %v73_v39 }
  0x17   :  { %117 = vmatpush.msra.mxu1 %v116_v62  ;;  %63 = vmatpush.msra.mxu0 %v519_v44  ;;  %v158_v46 = vand.u32 4294901760, %v157_v41 }
  0x18   :  { %194 = vmatpush.msra.mxu2 %v528_v47  ;;  %235 = vmatpush.msra.mxu3 %v519_v44 }
  0x19   :  { %123 = vmatpush.msra.mxu1 %v122_v3  ;;  %65 = vmatpush.msra.mxu0 %v530_v48 }
  0x1a   :  { %197 = vmatpush.msra.mxu2 %v543_v54  ;;  %237 = vmatpush.msra.mxu3 %v530_v48 }
  0x1b   :  { %129 = vmatpush.msra.mxu1 %v128_v13  ;;  %67 = vmatpush.msra.mxu0 %v545_v55 }
  0x1c   :  { %200 = vmatpush.msra.mxu2 %v557_v60  ;;  %239 = vmatpush.msra.mxu3 %v545_v55 }
  0x1d   :  { %135 = vmatpush.msra.mxu1 %v134_v31  ;;  %69 = vmatpush.msra.mxu0 %v559_v61 }
  0x1e   :  { %203 = vmatpush.msra.mxu2 %v569_v1  ;;  %241 = vmatpush.msra.mxu3 %v559_v61 }
  0x1f   :  { %255 = vmatpush.msrb.mxu0 %v84_v26  ;;  %141 = vmatpush.msra.mxu1 %v140_v37 }
  0x20   :  { %206 = vmatpush.msra.mxu2 %v580_v8  ;;  %245 = vmatmul.f32.vlgmr.msra.gmra.mxu3 %v72_v28 }
  0x21   :  { %259 = vmatpush.msrb.mxu0 %v90_v21  ;;  %147 = vmatpush.msra.mxu1 %v146_v40 }
  0x22   :  { %209 = vmatmul.f32.vlgmr.msra.gmra.mxu2 %v71_v2  ;;  %75 = vmatmul.f32.vlgmr.msra.gmra.mxu0 %v74_v45 }
  0x23   :  { %263 = vmatpush.msrb.mxu0 %v96_v22  ;;  %153 = vmatpush.msra.mxu1 %v152_v42 }
  0x25   :  { %267 = vmatpush.msrb.mxu0 %v102_v27  ;;  %159 = vmatpush.msra.mxu1 %v158_v46 }
  0x26   :  { %161 = vmatmul.f32.vlgmr.msra.gmra.mxu1 %v547_v56 }
  0x27   :  { %313 = vmatpush.msrb.mxu1 %v432_v9  ;;  %271 = vmatpush.msrb.mxu0 %v108_v29 }
  0x29   :  { %315 = vmatpush.msrb.mxu1 %v419_v4  ;;  %275 = vmatpush.msrb.mxu0 %v114_v35  ;;  %v362_v4 = vld [vmem:[%s649_s2] ss:$0 sm:$0xff] }
  0x2b   :  { %317 = vmatpush.msrb.mxu1 %v421_v5  ;;  %279 = vmatpush.msrb.mxu0 %v120_v43 }
  0x2d   :  { %319 = vmatpush.msrb.mxu1 %v434_v10  ;;  %283 = vmatpush.msrb.mxu0 %v126_v50 }
  0x2f   :  { %321 = vmatpush.msrb.mxu1 %v436_v11  ;;  %287 = vmatpush.msrb.mxu0 %v132_v59 }
  0x31   :  { %323 = vmatpush.msrb.mxu1 %v438_v12  ;;  %291 = vmatpush.msrb.mxu0 %v138_v0 }
  0x33   :  { %325 = vmatpush.msrb.mxu1 %v452_v17  ;;  %295 = vmatpush.msrb.mxu0 %v144_v7 }
  0x35   :  { %327 = vmatpush.msrb.mxu1 %v469_v24  ;;  %299 = vmatpush.msrb.mxu0 %v150_v25 }
  0x37   :  { %329 = vmatpush.msrb.mxu1 %v494_v33  ;;  %303 = vmatpush.msrb.mxu0 %v156_v34 }
  0x38   :  { %305 = vmatmul.f32.vlgmr.msrb.gmra.mxu0 %v547_v56 }
  0x39   :  { %331 = vmatpush.msrb.mxu1 %v519_v44 }
  0x3b   :  { %333 = vmatpush.msrb.mxu1 %v530_v48 }
  0x3d   :  { %335 = vmatpush.msrb.mxu1 %v545_v55 }
  0x3f   :  { %337 = vmatpush.msrb.mxu1 %v559_v61 }
  0x40   :  { %339 = vmatmul.f32.vlgmr.msrb.gmra.mxu1 %v547_v56 }
  0x9f   :  { %v76_v5 = vpop.f32.mrf.mxu0 }
  0xa0   :  { %v77_v9 = vadd.f32 %v362_v4, %v76_v5 }
  0xa3   :  { %v162_v10 = vpop.f32.mrf.mxu1  ;;  %v246_v16 = vpop.f32.mrf.mxu3 }
  0xa4   :  { %v163_v11 = vadd.f32 %v162_v10, %v77_v9 }
  0xa5   :  { %v210_v12 = vpop.f32.mrf.mxu2 }
  0xa6   :  { %v211_v15 = vadd.f32 %v210_v12, %v163_v11 }
  0xa8   :  { %v247_v17 = vadd.f32 %v246_v16, %v211_v15 }
  0xb5   :  { %v306_v18 = vpop.f32.mrf.mxu0 }
  0xb6   :  { %v307_v19 = vadd.f32 %v306_v18, %v247_v17 }
  0xbd   :  { %v340_v20 = vpop.f32.mrf.mxu1 }
  0xbe   :  { %v341_v21 = vadd.f32 %v340_v20, %v307_v19 }
  0xc0   :  { %344 = vst.msk [vmem:[#allocation2] sm:$0xff] %vm343_vm2, %v341_v21 }
  0xc1   :  { %355 = dma.vmem_to_hbm [thread:$0]  %s351_s14, 128, %s353_s17, [#allocation3]  }
  0xc2   :  { %387 = dma.done.wait [#allocation3], 128  }
  0xc3   :  { %388 = vsyncadd [#allocation3], 4294967168 }
  0xc4   :  { %360 = vsyncpa [#allocation3], 1 }

</bundles_post_ra>
